<compile_context>
chip_gen: v7x
topology: tpu7x:2x2x1
jax: 0.10.0
libtpu: 0.0.40
codegen_flags: <defaults>
</compile_context>

<pallas_src>
import functools

import jax
import jax.numpy as jnp
from jax.experimental import pallas as pl
from jax.experimental.pallas import tpu as pltpu


def conv1d_s2_kernel(w_ref, b_ref, ev_ref, od_ref, o_ref, halo_ref, *, od_len):
    """One (batch, L-tile) step of Conv1d(C, C, k=3, s=2, p=1).

    w_ref:    (3, C, C)  resident weight, w_ref[k] == W[:, :, k]  (C_out, C_in)
    b_ref:    (C, 1)     resident bias (f32)
    ev_ref:   (C, TL)    x[2j]    (tap k=1) for the output columns of this tile
    od_ref:   (C, TL)    x[2j+1]  (tap k=2)
    o_ref:    (C, TL)    output tile
    halo_ref: (C, 1)     carries x[2*(t+1)*TL - 1] into the next L tile
    od_len:   None, or the number of valid odd-tap columns (= L // 2) when L
              is odd -- the column at index od_len is the conv's right zero pad.
    """
    c, tl = ev_ref.shape
    t = pl.program_id(1)

    # Left conv padding == zero halo at the first L tile of each batch element.
    @pl.when(t == 0)
    def _():
        halo_ref[...] = jnp.zeros_like(halo_ref)

    ev = ev_ref[...]                 # tap k=1 : x[2j]
    od = od_ref[...]                 # tap k=2 : x[2j+1]
    h = halo_ref[...]                # x[2j-1] for the first column of this tile

    lane = None
    if (od_len is not None) or (tl % 128 == 0):
        lane = jax.lax.broadcasted_iota(jnp.int32, (c, tl), 1)

    if od_len is not None:
        # Odd L: x[L] does not exist (right zero padding) -> zero those columns.
        od = jnp.where(lane + t * tl < od_len, od, jnp.zeros_like(od))

    # Carry the last odd column into the next L tile of this batch element.
    halo_ref[...] = od[:, tl - 1:tl]

    # tap k=0 : x[2j-1] == odd stream shifted right by one column, halo in col 0.
    if tl % 128 == 0:
        # Lane rotate on the XLU + VPU select (no vector-store-slot copy).
        tap0 = jnp.where(lane == 0, h, pltpu.roll(od, shift=1, axis=1))
    elif tl > 1:
        tap0 = jnp.concatenate([h, od[:, :tl - 1]], axis=1)
    else:
        tap0 = h

    acc = jnp.dot(w_ref[1], ev, preferred_element_type=jnp.float32)
    acc = acc + jnp.dot(w_ref[2], od, preferred_element_type=jnp.float32)
    acc = acc + jnp.dot(w_ref[0], tap0, preferred_element_type=jnp.float32)
    o_ref[...] = (acc + b_ref[...]).astype(o_ref.dtype)


_DEFAULT_VMEM = 64 * 1024 * 1024   # v7x per-core VMEM; conservative fallback


def _vmem_capacity_bytes():
    try:
        cap = getattr(pltpu.get_tpu_info(), "vmem_capacity_bytes", None)
        if cap:
            return int(cap)
    except Exception:
        pass
    return _DEFAULT_VMEM


def _working_set_bytes(c, tl, itemsize):
    """Estimated VMEM working set of one grid step (double-buffered pipeline)."""
    return (2 * 3 * c * c * itemsize        # resident weight (pipeline 2-buffers it)
            + 2 * c * 4                     # resident bias (f32)
            + c * itemsize                  # halo scratch
            + 2 * 2 * c * tl * itemsize     # ev + od tiles, double-buffered
            + 2 * c * tl * itemsize)        # out tile, double-buffered


def _pick_l_tile(l_out, c, itemsize):
    """Largest lane tile whose working set fits ~45% of this chip's VMEM."""
    budget = int(_vmem_capacity_bytes() * 0.45)
    resident = 2 * 3 * c * c * itemsize + 2 * c * 4 + c * itemsize
    per_col = 6 * c * itemsize              # (ev + od + out) x double buffer
    avail = budget - resident
    if avail < 128 * per_col:
        cap = 128
    else:
        cap = (avail // per_col) // 128 * 128
    cap = int(max(128, min(2048, cap)))
    if l_out <= cap:
        return l_out                        # single full-extent block
    return cap                              # multiple of 128 -> lane-dense stores


def downsample1d(x, weight, bias, *, tile_l=None):
    """Conv1d(dim, dim, kernel=3, stride=2, padding=1) forward.

    x: (B, C, L); weight: (C, C, 3); bias: (C,)  ->  (B, C, L_out)
    """
    B, C, L = x.shape
    L_out = (L + 2 * 1 - 3) // 2 + 1
    itemsize = jnp.dtype(x.dtype).itemsize

    TL = tile_l if tile_l is not None else _pick_l_tile(L_out, C, itemsize)
    n_t = pl.cdiv(L_out, TL)

    # Single strided-slice pass over x -> even/odd tap streams. No pad round
    # trips: the ragged last tile and odd-L right padding are handled in-kernel.
    ev = x[:, :, 0::2]                       # (B, C, L_out)    x[2j]
    od = x[:, :, 1::2]                       # (B, C, L // 2)   x[2j+1]
    if od.shape[2] == 0:                     # degenerate L == 1
        od = jnp.zeros((B, C, 1), x.dtype)
    od_len = (L // 2) if (L % 2 == 1) else None

    w3 = jnp.transpose(weight, (2, 0, 1)).astype(x.dtype)   # (3, C_out, C_in)
    b2 = bias.reshape(C, 1).astype(jnp.float32)

    vmem_cap = _vmem_capacity_bytes()
    vmem_limit = int(min(vmem_cap - (2 << 20),
                         max(32 << 20, 2 * _working_set_bytes(C, TL, itemsize))))

    out = pl.pallas_call(
        functools.partial(conv1d_s2_kernel, od_len=od_len),
        out_shape=jax.ShapeDtypeStruct((B, C, L_out), x.dtype),
        grid_spec=pltpu.PrefetchScalarGridSpec(
            num_scalar_prefetch=0,
            grid=(B, n_t),
            in_specs=[
                pl.BlockSpec((3, C, C), lambda b, t: (0, 0, 0)),      # weight (resident)
                pl.BlockSpec((C, 1), lambda b, t: (0, 0)),            # bias   (resident)
                pl.BlockSpec((None, C, TL), lambda b, t: (b, 0, t)),  # even taps
                pl.BlockSpec((None, C, TL), lambda b, t: (b, 0, t)),  # odd taps
            ],
            out_specs=pl.BlockSpec((None, C, TL), lambda b, t: (b, 0, t)),
            scratch_shapes=[pltpu.VMEM((C, 1), x.dtype)],             # halo carry
        ),
        compiler_params=pltpu.CompilerParams(
            # B axis parallel (megacore); L axis must stay sequential ("arbitrary")
            # and innermost -- it carries the halo between consecutive tiles.
            dimension_semantics=("parallel", "arbitrary"),
            vmem_limit_bytes=vmem_limit,
        ),
    )(w3, b2, ev, od)
    return out


def _reference(x, weight, bias):
    # pure-JAX reference using lax.conv_general_dilated (NCL layout)
    out = jax.lax.conv_general_dilated(
        x, weight,
        window_strides=(2,),
        padding=((1, 1),),
        dimension_numbers=("NCH", "OIH", "NCH"),
    )
    return out + bias[None, :, None]


if __name__ == "__main__":
    key = jax.random.PRNGKey(0)
    k_x, k_w, k_b, k_x2, k_x3, k_x4 = jax.random.split(key, 6)

    # --- base case: B=2, C=4, L=16, f32 ------------------------------------
    B, C, L = 2, 4, 16  # dim = C = 4
    x = jax.random.normal(k_x, (B, C, L), dtype=jnp.float32)
    bound = 1.0 / jnp.sqrt(jnp.array(C * 3, dtype=jnp.float32))
    weight = jax.random.uniform(k_w, (C, C, 3), jnp.float32, -bound, bound)
    bias = jax.random.uniform(k_b, (C,), jnp.float32, -bound, bound)

    out = jax.block_until_ready(downsample1d(x, weight, bias))
    ref = _reference(x, weight, bias)
    assert out.shape == (B, C, (L + 2 - 3) // 2 + 1)
    assert jnp.allclose(out, ref, atol=1e-5, rtol=1e-5)

    # --- odd L (exercises the in-kernel right-padding mask) -----------------
    x_odd = jax.random.normal(k_x2, (B, C, 15), dtype=jnp.float32)
    out_odd = jax.block_until_ready(downsample1d(x_odd, weight, bias))
    ref_odd = _reference(x_odd, weight, bias)
    assert out_odd.shape == ref_odd.shape
    assert jnp.allclose(out_odd, ref_odd, atol=1e-5, rtol=1e-5)

    # --- multi-tile: halo carry + ragged last tile + roll path --------------
    C2, L2 = 8, 402
    x_big = jax.random.normal(k_x3, (1, C2, L2), dtype=jnp.float32)
    bound2 = 1.0 / jnp.sqrt(jnp.array(C2 * 3, dtype=jnp.float32))
    w_big = jax.random.uniform(k_w, (C2, C2, 3), jnp.float32, -bound2, bound2)
    b_big = jax.random.uniform(k_b, (C2,), jnp.float32, -bound2, bound2)
    out_big = jax.block_until_ready(downsample1d(x_big, w_big, b_big, tile_l=128))
    ref_big = _reference(x_big, w_big, b_big)
    assert out_big.shape == ref_big.shape
    assert jnp.allclose(out_big, ref_big, atol=1e-4, rtol=1e-4)

    # --- bf16 operands, f32 accumulation -------------------------------------
    x_bf = jax.random.normal(k_x4, (1, C2, 32), dtype=jnp.float32).astype(jnp.bfloat16)
    out_bf = jax.block_until_ready(downsample1d(x_bf, w_big, b_big))
    ref_bf = _reference(x_bf.astype(jnp.float32),
                        w_big.astype(jnp.bfloat16).astype(jnp.float32), b_big)
    assert jnp.allclose(out_bf.astype(jnp.float32), ref_bf, atol=5e-2, rtol=5e-2)

    print("KERNEL_OK")
</pallas_src>

<mosaic_0001>
module attributes {stable_mosaic.version = 11 : i64} {
  func.func @conv1d_s2_kernel(%arg0: i32, %arg1: i32, %arg2: memref<3x4x4xf32, #tpu.memory_space<vmem>>, %arg3: memref<4x1xf32, #tpu.memory_space<vmem>>, %arg4: memref<1x4x8xf32, #tpu.memory_space<vmem>>, %arg5: memref<1x4x8xf32, #tpu.memory_space<vmem>>, %arg6: memref<1x4x8xf32, #tpu.memory_space<vmem>>, %arg7: memref<4x1xf32, #tpu.memory_space<vmem>>) attributes {dimension_semantics = [#tpu.dimension_semantics<parallel>, #tpu.dimension_semantics<arbitrary>], iteration_bounds = array<i64: 2, 1>, scalar_prefetch = 0 : i64, scratch_operands = 1 : i64, tpu.core_type = #tpu.core_type<tc>, window_params = [{pipeline_mode = #tpu.pipeline_mode<synchronous>, transform_indices = @transform_0, window_bounds = array<i64: 3, 4, 4>}, {pipeline_mode = #tpu.pipeline_mode<synchronous>, transform_indices = @transform_1, window_bounds = array<i64: 4, 1>}, {transform_indices = @transform_2, window_bounds = array<i64: 1, 4, 8>}, {transform_indices = @transform_3, window_bounds = array<i64: 1, 4, 8>}, {transform_indices = @transform_4, window_bounds = array<i64: 1, 4, 8>}]} {
    %c0_i32 = arith.constant 0 : i32
    %0 = arith.cmpi eq, %arg1, %c0_i32 : i32
    %1 = arith.extui %0 : i1 to i32
    %c0_i32_0 = arith.constant 0 : i32
    %2 = arith.cmpi ne, %1, %c0_i32_0 : i32
    scf.if %2 {
      %cst_24 = arith.constant 0.000000e+00 : f32
      %29 = vector.broadcast %cst_24 : f32 to vector<4x1xf32>
      %c0_25 = arith.constant 0 : index
      %c0_26 = arith.constant 0 : index
      %30 = vector.load %arg7[%c0_25, %c0_26] : memref<4x1xf32, #tpu.memory_space<vmem>>, vector<4x1xf32>
      tpu.vector_store %arg7[%c0_25, %c0_26], %29 {strides = array<i32>} : memref<4x1xf32, #tpu.memory_space<vmem>>, vector<4x1xf32>,
    } else {
    }
    %c0 = arith.constant 0 : index
    %c0_1 = arith.constant 0 : index
    %c0_2 = arith.constant 0 : index
    %3 = vector.load %arg4[%c0, %c0_1, %c0_2] : memref<1x4x8xf32, #tpu.memory_space<vmem>>, vector<1x4x8xf32>
    %4 = vector.shape_cast %3 : vector<1x4x8xf32> to vector<4x8xf32>
    %c0_3 = arith.constant 0 : index
    %c0_4 = arith.constant 0 : index
    %c0_5 = arith.constant 0 : index
    %5 = vector.load %arg5[%c0_3, %c0_4, %c0_5] : memref<1x4x8xf32, #tpu.memory_space<vmem>>, vector<1x4x8xf32>
    %6 = vector.shape_cast %5 : vector<1x4x8xf32> to vector<4x8xf32>
    %c0_6 = arith.constant 0 : index
    %c0_7 = arith.constant 0 : index
    %7 = vector.load %arg7[%c0_6, %c0_7] : memref<4x1xf32, #tpu.memory_space<vmem>>, vector<4x1xf32>
    %8 = vector.extract_strided_slice %6 {offsets = [0, 7], sizes = [4, 1], strides = [1, 1]} : vector<4x8xf32> to vector<4x1xf32>
    %c0_8 = arith.constant 0 : index
    %c0_9 = arith.constant 0 : index
    %9 = vector.load %arg7[%c0_8, %c0_9] : memref<4x1xf32, #tpu.memory_space<vmem>>, vector<4x1xf32>
    tpu.vector_store %arg7[%c0_8, %c0_9], %8 {strides = array<i32>} : memref<4x1xf32, #tpu.memory_space<vmem>>, vector<4x1xf32>,
    %10 = vector.extract_strided_slice %6 {offsets = [0, 0], sizes = [4, 7], strides = [1, 1]} : vector<4x8xf32> to vector<4x7xf32>
    %11 = tpu.concatenate %7, %10 in 1 : vector<4x1xf32>, vector<4x7xf32> -> vector<4x8xf32>
    %c1 = arith.constant 1 : index
    %c0_10 = arith.constant 0 : index
    %c0_11 = arith.constant 0 : index
    %12 = vector.load %arg2[%c1, %c0_10, %c0_11] : memref<3x4x4xf32, #tpu.memory_space<vmem>>, vector<1x4x4xf32>
    %13 = vector.shape_cast %12 : vector<1x4x4xf32> to vector<4x4xf32>
    %cst = arith.constant dense<0.000000e+00> : vector<4x8xf32>
    %14 = tpu.matmul %13, %4, %cst {dimension_numbers = #tpu.dot_dimension_numbers<[1], [0], [0], [1], [0, 0, 1, 1], [], []>} : vector<4x4xf32>, vector<4x8xf32>, vector<4x8xf32> -> vector<4x8xf32>
    %c2 = arith.constant 2 : index
    %c0_12 = arith.constant 0 : index
    %c0_13 = arith.constant 0 : index
    %15 = vector.load %arg2[%c2, %c0_12, %c0_13] : memref<3x4x4xf32, #tpu.memory_space<vmem>>, vector<1x4x4xf32>
    %16 = vector.shape_cast %15 : vector<1x4x4xf32> to vector<4x4xf32>
    %cst_14 = arith.constant dense<0.000000e+00> : vector<4x8xf32>
    %17 = tpu.matmul %16, %6, %cst_14 {dimension_numbers = #tpu.dot_dimension_numbers<[1], [0], [0], [1], [0, 0, 1, 1], [], []>} : vector<4x4xf32>, vector<4x8xf32>, vector<4x8xf32> -> vector<4x8xf32>
    %18 = arith.addf %14, %17 : vector<4x8xf32>
    %c0_15 = arith.constant 0 : index
    %c0_16 = arith.constant 0 : index
    %c0_17 = arith.constant 0 : index
    %19 = vector.load %arg2[%c0_15, %c0_16, %c0_17] : memref<3x4x4xf32, #tpu.memory_space<vmem>>, vector<1x4x4xf32>
    %20 = vector.shape_cast %19 : vector<1x4x4xf32> to vector<4x4xf32>
    %cst_18 = arith.constant dense<0.000000e+00> : vector<4x8xf32>
    %21 = tpu.matmul %20, %11, %cst_18 {dimension_numbers = #tpu.dot_dimension_numbers<[1], [0], [0], [1], [0, 0, 1, 1], [], []>} : vector<4x4xf32>, vector<4x8xf32>, vector<4x8xf32> -> vector<4x8xf32>
    %22 = arith.addf %18, %21 : vector<4x8xf32>
    %c0_19 = arith.constant 0 : index
    %c0_20 = arith.constant 0 : index
    %23 = vector.load %arg3[%c0_19, %c0_20] : memref<4x1xf32, #tpu.memory_space<vmem>>, vector<4x1xf32>
    %24 = vector.broadcast %23 : vector<4x1xf32> to vector<4x8xf32>
    %25 = arith.addf %22, %24 : vector<4x8xf32>
    %c0_21 = arith.constant 0 : index
    %c0_22 = arith.constant 0 : index
    %c0_23 = arith.constant 0 : index
    %26 = vector.load %arg6[%c0_21, %c0_22, %c0_23] : memref<1x4x8xf32, #tpu.memory_space<vmem>>, vector<1x4x8xf32>
    %27 = vector.shape_cast %26 : vector<1x4x8xf32> to vector<4x8xf32>
    %28 = vector.shape_cast %25 : vector<4x8xf32> to vector<1x4x8xf32>
    tpu.vector_store %arg6[%c0_21, %c0_22, %c0_23], %28 {strides = array<i32>} : memref<1x4x8xf32, #tpu.memory_space<vmem>>, vector<1x4x8xf32>,
    return
  }
  func.func @transform_0(%arg0: i32, %arg1: i32) -> (i32, i32, i32) {
    %c0_i32 = arith.constant 0 : i32
    %c0_i32_0 = arith.constant 0 : i32
    %c0_i32_1 = arith.constant 0 : i32
    %c0_i32_2 = arith.constant 0 : i32
    return %c0_i32, %c0_i32_0, %c0_i32_1 : i32, i32, i32
  }
  func.func @transform_1(%arg0: i32, %arg1: i32) -> (i32, i32) {
    %c0_i32 = arith.constant 0 : i32
    %c0_i32_0 = arith.constant 0 : i32
    %c0_i32_1 = arith.constant 0 : i32
    return %c0_i32, %c0_i32_0 : i32, i32
  }
  func.func @transform_2(%arg0: i32, %arg1: i32) -> (i32, i32, i32) {
    %c0_i32 = arith.constant 0 : i32
    %c0_i32_0 = arith.constant 0 : i32
    return %arg0, %c0_i32, %arg1 : i32, i32, i32
  }
  func.func @transform_3(%arg0: i32, %arg1: i32) -> (i32, i32, i32) {
    %c0_i32 = arith.constant 0 : i32
    %c0_i32_0 = arith.constant 0 : i32
    return %arg0, %c0_i32, %arg1 : i32, i32, i32
  }
  func.func @transform_4(%arg0: i32, %arg1: i32) -> (i32, i32, i32) {
    %c0_i32 = arith.constant 0 : i32
    %c0_i32_0 = arith.constant 0 : i32
    return %arg0, %c0_i32, %arg1 : i32, i32, i32
  }
}

</mosaic_0001>

<bundles_post_ra>
// kernel: tpu_custom_call.1
= control target key start
LH: loop header
LB: loop body
LE: loop exit
PB: predicated region body
PF: predicated region fallthrough
CT: control target
= control target key end

     0   :  { %9 = vsyncpa [#allocation4], 0  ;;  %s1066_s0 = inlined_call_operand.hbm [shape: f32[3,4,4], index: 0, kind: input, shape index: {}]   ;;  %s1067_s1 = inlined_call_operand.vmem [shape: f32[4,1], index: 1, kind: input, shape index: {}]   ;;  %s1068_s2 = inlined_call_operand.vmem [shape: f32[2,4,8], index: 2, kind: input, shape index: {}]   ;;  %s1069_s3 = inlined_call_operand.vmem [shape: f32[2,4,8], index: 3, kind: input, shape index: {}]   ;;  %s1070_s4 = inlined_call_operand.hbm [shape: f32[2,4,8], index: 4, kind: output, shape index: {}]  }
   0x1   :  { %10 = vsyncpa [#allocation5], 0 }
   0x2   :  { %12 = vsyncpa [#allocation5 + $0x1], 0  ;;  %s899_s15 = smov 0   ;;  %s901_s16 = smov 0  }
   0x3   :  { %s903_s17 = smov 0   ;;  %s905_s18 = smov 0  }
   0x4   :  { %s907_s19 = smov 0   ;;  %s909_s20 = smov 0  }
   0x5 LB: > { %s638_s21 = sadd.s32 4294967295, %s863_s20   ;;  %s639_s22 = sadd.s32 4294967294, %s863_s20   ;;  %s863_s20 = sphi %s909_s20, %s18_s20   ;;  %s859_s19 = sphi %s907_s19, %s1088_s19   ;;  %s855_s18 = sphi %s905_s18, %s1087_s18   ;;  %s851_s17 = sphi %s903_s17, %s1086_s17   ;;  %s847_s16 = sphi %s901_s16, %s1085_s16   ;;  %s843_s15 = sphi %s899_s15, %s1084_s15  }
   0x6   : > { %s30_s23 = sadd.s32 1, %s859_s19  ;;  %s137_s24 = sadd.s32 1, %s851_s17 }
   0x7   : > { %p32_p0 = scmp.ge.s32.totalorder %s30_s23, 2  ;;  %p147_p1 = scmp.ne.s32.totalorder %s851_s17, %s847_s16 }
   0x8   : > { %p148_p2 = scmp.eq.s32.totalorder %s638_s21, 1  ;;  %p153_p3 = scmp.ne.s32.totalorder %s847_s16, %s843_s15 }
   0x9   : > { %s1090_s23 = smov (%p32_p0, %s30_s23), 0  ;;  %p154_p5 = scmp.eq.s32.totalorder %s639_s22, 1 }
   0xa   : > { %p939_p4 = por %p148_p2, %p147_p1  ;;  %s132_s26 = ssub.s32 %s859_s19, %s1090_s23 }
   0xb   : > { %p640_p6 = scmp.ge.s32.totalorder %s863_s20, 1  ;;  %p135_p7 = scmp.eq.s32.totalorder %s132_s26, 0 }
   0xc   : > { %s1075_s25 = scalar_select %p939_p4, 1, 0 }
   0xd   : > { %p946_p8 = por %p154_p5, %p153_p3  ;;  %p161_p9 = scmp.lt.s32.totalorder %s863_s20, 3 }
   0xe   : > { %s952_s28 = scalar_select %p135_p7, %s851_s17, %s137_s24  }
   0xf   : > { %s1076_s27 = scalar_select %p946_p8, 1, 0 }
  0x10   : > { %p954_p10 = pnand %p640_p6, %p161_p9  ;;  %p958_p11 = scmp.eq.s32.totalorder %s638_s21, 0 }
  0x11   : > { %s865_s5 = smov [#allocation3]   ;;  %s753_s10 = scalar_lea.hbm %s1066_s0, 192 }
  0x12   : > { %s1077_s29 = scalar_select %p954_p10, 1, 0 }
  0x13   : > { %s1078_s30 = scalar_select %p958_p11, 1, 0 }
  0x14   : > { %p685_p12 = pneg %p954_p10  ;;  %s173_s6 = sshll.u32 %s865_s5, 4  ;;  %s174_s6 = int_to_ptr.vmem [resolvable:$true] %s173_s6 }
  0x15   : > { %p754_p0 = scmp.ne.s32.totalorder %s1066_s0, %s753_s10  ;;  %p760_p5 = scmp.lt.u32.totalorder %s753_s10, %s1066_s0 }
  0x16   : > { %p966_p13 = pnand %p958_p11, %p685_p12 }
  0x18   : > { %p755_p1 = pneg %p966_p13 }
  0x1a   : > { %p756_p2 = pnand %p755_p1, %p754_p0 }
  0x1c   : > { %p757_p3 = pneg %p756_p2 }
  0x1e   : > { %p762_p6 = pnand %p760_p5, %p757_p3 }
  0x20   : > { %765 = shalt.err (!%p762_p6)
}
  0x21   : > { %s766_s21 = scalar_lea.vmem %s174_s6, 192  ;;  %p774_p8 = scmp.lt.s32.totalorder %s174_s6, %s174_s6 }
  0x22   : > { %p767_p7 = scmp.ne.s32.totalorder %s174_s6, %s766_s21  ;;  %p775_p4 = scmp.lt.s32.totalorder %s766_s21, %s766_s21 }
  0x24   : > { %p769_p9 = pnand %p767_p7, %p755_p1  ;;  %p776_p11 = por %p775_p4, %p774_p8 }
  0x26   : > { %p770_p12 = pneg %p769_p9 }
  0x28   : > { %p777_p10 = pnand %p776_p11, %p770_p12 }
  0x2a   : > { %780 = shalt.err (!%p777_p10)
}
  0x2b   : > { %s866_s22 = smov 64   ;;  %s867_s24 = smov 4  }
  0x2c   : > { %688 = dma.hbm_to_vmem [thread:$0]  (!%p966_p13), %s1066_s0, 192, %s174_s6, [#allocation4], %s866_s22, %s866_s22, %s867_s24  }
  0x2d   : > { %p1080_p0 = scmp.ne.s32.totalorder %s1077_s29, 0 }
  0x2e   : > { %p1081_p2 = scmp.ne.s32.totalorder (!%p1080_p0), %s1078_s30, 0 }
  0x2f   : > { %212 = sbr.rel (%p1080_p0) target bundleno = 409 (0x199), region = 36 }
  0x36   : > { %834 = dma.done.wait (%p1081_p2), [#allocation4], 192  }
  0x37   : > { %836 = vsyncadd (%p1081_p2), [#allocation4], 4294967104  ;;  %p247_p4 = scmp.lt.s32.totalorder %s855_s18, 1  ;;  %vm265_vm0 = vcmask 3072   ;;  %v868_v0 = vmov 0.0   ;;  %vm869_vm1 = vmmov 0  }
  0x38   : > { %266 = vst.msk [vmem:[#allocation2] sm:$0xf] %vm265_vm0, %v868_v0  ;;  %664 = vmatprep.subr.mxu0 %v868_v0  ;;  %669 = vmatprep.subr.mxu1 %v868_v0  ;;  %v870_v1 = vmov 0   ;;  %vm289_vm2 = vcmask 1043456   ;;  %vm285_vm3 = vcmask 31744   ;;  %s871_s12 = smov 1  }
  0x39   : > { %s248_s7 = scalar_select %p247_p4, %s855_s18, 1  ;;  %666 = vmatprep.mubr.msk.f32.mxu0 %vm869_vm1, %v868_v0  ;;  %671 = vmatprep.mubr.msk.f32.mxu1 %vm869_vm1, %v868_v0  ;;  %v284_v3 = vld [vmem:[#allocation3 + $0x8] sm:$0xf]  ;;  %v282_v5 = vld [vmem:[#allocation3 + $0x4] sm:$0xf]  ;;  %vm279_vm4 = vcmask 7168  }
  0x3a   : > { %752 = vset.pattern.permute.xlu0 %v870_v1  ;;  %v516_v6 = vld [vmem:[%s1067_s1] sm:$0xf]  ;;  %s872_s21 = smov 121   ;;  %v438_v9 = vld [vmem:[#allocation3] sm:$0xf]  ;;  %s244_s22 = sand.u32 1, %s847_s16  }
  0x3b   : > { %s646_s29 = sshll.u32 %s248_s7, 2  ;;  %s645_s24 = sshll.u32 %s244_s22, 2  ;;  %vm523_vm5 = vcmask 60416  }
  0x3c   : > { %s260_s8 = scalar_lea.vmem %s1069_s3, %s646_s29  ;;  %s253_s11 = scalar_lea.vmem %s1068_s2, %s646_s29 }
  0x3d   : > { %v268_v2 = vld [vmem:[%s260_s8] sm:$0xf]  ;;  %s655_s26 = sshll.u32 %s855_s18, 6  ;;  %s246_s5 = scalar_lea.vmem [#allocation6], %s645_s24 }
  0x3e   : > { %v267_v4 = vld [vmem:[%s253_s11] sm:$0xf]  ;;  %276 = vrot.lane.b32.xlu0 %v268_v2, %s871_s12  ;;  %665 = vmatpush3.msk.msra.mxu0 %vm289_vm2, %v268_v2  ;;  %s540_s7 = sshll.u32 %s246_s5, 4  ;;  %s1019_s6 = scalar_lea.hbm %s1070_s4, %s655_s26  ;;  %s1021_s7 = int_to_ptr.vmem [resolvable:$true] %s540_s7 }
  0x3f   : > { %667 = vmatmul.mubr.msk.f32.vlgmr.msra.gmra.mrb[0].mxu0 %vm285_vm3, %v284_v3  ;;  %670 = vmatpush3.msk.msra.mxu1 %vm289_vm2, %v267_v4  ;;  %v269_v7 = vld [vmem:[#allocation2] sm:$0xf]  ;;  %s526_s8 = scalar_lea.sflag [#allocation5], %s244_s22  ;;  %s781_s9 = scalar_lea.vmem %s1021_s7, 64 }
  0x40   : > { %674 = vmatprep.subr.mxu0 %v868_v0  ;;  %672 = vmatmul.mubr.msk.f32.vlgmr.msra.gmra.mrb[0].mxu1 %vm285_vm3, %v282_v5  ;;  %p782_p8 = scmp.ne.s32.totalorder %s1021_s7, %s781_s9  ;;  %p1082_p10 = scmp.ne.s32.totalorder %s1075_s25, 0 }
  0x41   : > { %676 = vmatprep.mubr.msk.f32.mxu0 %vm869_vm1, %v868_v0  ;;  %271 = vrot.lane.b32.xlu1 %v268_v2, %s872_s21  ;;  %s873_s18 = smov [#allocation6]  }
  0x42   : > { %519 = vperm.xlu0 %752, %v516_v6   ;;  %p783_p11 = pnand %p782_p8, %p1082_p10  ;;  %s785_s10 = sshll.u32 %s873_s18, 4  ;;  %s786_s10 = int_to_ptr.vmem [resolvable:$false] %s785_s10 }
  0x43   : > { %s787_s11 = scalar_lea.vmem %s786_s10, 128  ;;  %p788_p1 = scmp.lt.s32.totalorder %s1021_s7, %s786_s10 }
  0x44   : > { %p784_p13 = pneg %p783_p11  ;;  %p789_p3 = scmp.lt.s32.totalorder %s787_s11, %s781_s9 }
  0x46   : > { %p790_p5 = por %p789_p3, %p788_p1 }
  0x48   : > { %p791_p6 = pnand %p790_p5, %p784_p13 }
  0xb0   : > { %v277_v8 = vpop.permute.xlu0 %276 }
  0xb1   : > { %v280_v10 = vsel %vm279_vm4, %v269_v7, %v277_v8 }
  0xb2   : > { %675 = vmatpush3.msk.msra.mxu0 %vm289_vm2, %v280_v10 }
  0xb3   : > { %677 = vmatmul.mubr.msk.f32.vlgmr.msra.gmra.mrb[2].mxu0 %vm285_vm3, %v438_v9  ;;  %v272_v11 = vpop.permute.xlu1 %271 }
  0xb4   : > { %275 = vst.msk [vmem:[#allocation2] sm:$0xf] %vm265_vm0, %v272_v11 }
  0xc1   : > { %v520_v18 = vpop.permute.xlu0 %519 }
 0x112   : > { %v358_v12 = vpop.f32.mrb[0].mxu0 }
 0x113   : > { %v668_v13 = vpop.f32.mrb[1].mxu0  ;;  %v434_v14 = vpop.f32.mrb[0].mxu1 }
 0x114   : > { %v435_v15 = vadd.f32 %v434_v14, %v358_v12  ;;  %v673_v16 = vpop.f32.mrb[1].mxu1 }
 0x186   : > { %v511_v17 = vpop.f32.mrb[2].mxu0 }
 0x187   : > { %v515_v19 = vadd.f32 %v511_v17, %v435_v15  ;;  %v678_v20 = vpop.f32.mrb[3].mxu0 }
 0x189   : > { %v522_v21 = vadd.f32 %v520_v18, %v515_v19 }
 0x18b   : > { %524 = vst.msk [vmem:[%s246_s5] sm:$0xf] %vm523_vm5, %v522_v21 }
 0x18c   : > { %794 = shalt.err (!%p791_p6)
}
 0x18d   : > { %s795_s12 = scalar_lea.hbm %s1019_s6, 64  ;;  %s799_s21 = scalar_lea.hbm %s1070_s4, 128 }
 0x18e   : > { %p796_p7 = scmp.ne.s32.totalorder %s1019_s6, %s795_s12  ;;  %p800_p0 = scmp.lt.u32.totalorder %s1019_s6, %s1070_s4 }
 0x18f   : > { %p801_p2 = scmp.lt.u32.totalorder %s799_s21, %s795_s12  ;;  %p803_p8 = scmp.lt.u32.totalorder %s795_s12, %s1019_s6 }
 0x190   : > { %p797_p9 = pnand %p796_p7, %p1082_p10 }
 0x191   : > { %p802_p4 = por %p801_p2, %p800_p0 }
 0x192   : > { %p798_p12 = pneg %p797_p9 }
 0x193   : > { %p804_p11 = por %p803_p8, %p802_p4 }
 0x195   : > { %p805_p13 = pnand %p804_p11, %p798_p12 }
 0x197   : > { %808 = shalt.err (!%p805_p13)
}
 0x198   : > { %683 = dma.vmem_to_hbm [thread:$0]  (%p1082_p10), %s1021_s7, 64, %s1019_s6, %s526_s8  }
 0x199 PF: > { %p695_p1 = scmp.ge.s32.totalorder %s863_s20, 2  ;;  %s552_s26 = sand.u32 1, %s843_s15  }
 0x19a   : > { %p1083_p3 = scmp.ne.s32.totalorder %s1076_s27, 0  ;;  %s553_s5 = scalar_lea.sflag [#allocation5], %s552_s26 }
 0x19c   : > { %p690_p5 = pnand %p695_p1, %p1083_p3 }
 0x19e   : > { %838 = dma.done.wait (!%p690_p5), %s553_s5, 64  }
 0x19f   : > { %840 = vsyncadd (!%p690_p5), %s553_s5, 4294967232  ;;  %s18_s20 = sadd.s32 1, %s863_s20   ;;  %s1084_s15 = smov %s847_s16 }
 0x1a0   : > { %p15_p6 = scmp.ge.s32.totalorder %s18_s20, 4   ;;  %s1085_s16 = smov %s851_s17 }
 0x1a1   : > { %s1086_s17 = smov %s952_s28  ;;  %s1087_s18 = smov %s859_s19 }
 0x1a2   : > { %s1088_s19 = smov %s1090_s23  ;;  %17 = sbr.rel (!%p15_p6) target bundleno = 5 (0x5), region = 85 }
 0x1a9   :  { %558 = vsyncpa [#allocation4], 1 }
 0x1aa   :  { %560 = vsyncpa [#allocation4 + $0x1], 1 }
 0x1ab   :  { %561 = vsyncpa [#allocation5], 1 }
 0x1ac   :  { %563 = vsyncpa [#allocation5 + $0x1], 1 }

</bundles_post_ra>
